<compile_context>
chip_gen: v6e
topology: v6e:2x2x1
jax: 0.10.0
libtpu: 0.0.40
codegen_flags: <defaults>
</compile_context>

<pallas_src>
import jax
import jax.numpy as jnp
from jax.experimental import pallas as pl
from jax.experimental.pallas import tpu as pltpu

IN_DIM = 28 * 28   # 784
HID_DIM = 256
OUT_DIM = 10
OUT_PAD = 128      # lane-dense padded output width (>= OUT_DIM, multiple of 128)


def mlp_kernel(x_ref, w1_ref, b1_ref, w2_ref, b2_ref, o_ref):
    # Layer 1: Linear(784 -> 256) + Sigmoid.
    # bf16 operands on the MXU, f32 accumulation; activation math in f32.
    h = jnp.dot(x_ref[...], w1_ref[...], preferred_element_type=jnp.float32)
    h = jax.nn.sigmoid(h + b1_ref[...])            # b1 is (1, 256), broadcasts

    # Layer 2: Linear(256 -> 128 padded) + Sigmoid (extra 118 cols are zeros,
    # sliced off in the wrapper).
    o = jnp.dot(h.astype(w2_ref.dtype), w2_ref[...],
                preferred_element_type=jnp.float32)
    o_ref[...] = jax.nn.sigmoid(o + b2_ref[...]).astype(o_ref.dtype)


def net_forward(x, w1, b1, w2, b2, *, tile_b=512):
    batch = x.shape[0]

    # --- wrapper-side layout plumbing (padding / casting, no compute) ------
    # Batch tile: multiple of 8 sublanes, capped at tile_b (512 is safe on
    # v5e/v6e/v7x VMEM budgets); pad batch up to a multiple of it.
    tb = min(tile_b, max(8, ((batch + 7) // 8) * 8))
    padded_batch = ((batch + tb - 1) // tb) * tb
    if padded_batch != batch:
        x = jnp.pad(x, ((0, padded_batch - batch), (0, 0)))

    # Lane-dense second layer: pad OUT_DIM (10) -> 128 with zeros.
    w2p = jnp.zeros((HID_DIM, OUT_PAD), w2.dtype).at[:, :OUT_DIM].set(w2)
    b2p = jnp.zeros((1, OUT_PAD), b2.dtype).at[0, :OUT_DIM].set(b2)

    # bf16 matmul operands; biases stay f32 (added to the f32 accumulator).
    x_bf = x.astype(jnp.bfloat16)
    w1_bf = w1.astype(jnp.bfloat16)
    w2_bf = w2p.astype(jnp.bfloat16)
    b1f = b1.reshape(1, HID_DIM).astype(jnp.float32)
    b2f = b2p.astype(jnp.float32)

    grid = (padded_batch // tb,)

    flops = 2 * padded_batch * (IN_DIM * HID_DIM + HID_DIM * OUT_PAD)
    bytes_accessed = (x_bf.size * 2 + w1_bf.size * 2 + w2_bf.size * 2
                      + b1f.size * 4 + b2f.size * 4
                      + padded_batch * OUT_PAD * 4)
    cost = pl.CostEstimate(
        flops=flops,
        transcendentals=padded_batch * (HID_DIM + OUT_PAD),
        bytes_accessed=bytes_accessed,
    )

    out_padded = pl.pallas_call(
        mlp_kernel,
        out_shape=jax.ShapeDtypeStruct((padded_batch, OUT_PAD), jnp.float32),
        grid_spec=pltpu.PrefetchScalarGridSpec(
            num_scalar_prefetch=0,
            grid=grid,
            in_specs=[
                pl.BlockSpec((tb, IN_DIM), lambda i: (i, 0)),         # x tile
                pl.BlockSpec((IN_DIM, HID_DIM), lambda i: (0, 0)),    # w1 (resident)
                pl.BlockSpec((1, HID_DIM), lambda i: (0, 0)),         # b1 (resident)
                pl.BlockSpec((HID_DIM, OUT_PAD), lambda i: (0, 0)),   # w2 (resident)
                pl.BlockSpec((1, OUT_PAD), lambda i: (0, 0)),         # b2 (resident)
            ],
            out_specs=pl.BlockSpec((tb, OUT_PAD), lambda i: (i, 0)),
        ),
        compiler_params=pltpu.CompilerParams(
            dimension_semantics=("parallel",),
        ),
        cost_estimate=cost,
    )(x_bf, w1_bf, b1f, w2_bf, b2f)

    # Strip batch padding and the lane padding of the last layer.
    return out_padded[:batch, :OUT_DIM]


def init_params(key):
    """Deterministic init mimicking PyTorch's default Linear init
    (uniform in +/- 1/sqrt(fan_in))."""
    k1, k2, k3, k4 = jax.random.split(key, 4)
    s1 = 1.0 / jnp.sqrt(IN_DIM)
    s2 = 1.0 / jnp.sqrt(HID_DIM)
    w1 = jax.random.uniform(k1, (IN_DIM, HID_DIM), jnp.float32, -s1, s1)
    b1 = jax.random.uniform(k2, (HID_DIM,), jnp.float32, -s1, s1)
    w2 = jax.random.uniform(k3, (HID_DIM, OUT_DIM), jnp.float32, -s2, s2)
    b2 = jax.random.uniform(k4, (OUT_DIM,), jnp.float32, -s2, s2)
    return w1, b1, w2, b2


if __name__ == "__main__":
    key = jax.random.PRNGKey(0)
    k_params, k_x = jax.random.split(key)

    batch = 8
    x = jax.random.normal(k_x, (batch, IN_DIM), jnp.float32)
    w1, b1, w2, b2 = init_params(k_params)

    out = net_forward(x, w1, b1, w2, b2)
    out = jax.block_until_ready(out)

    # Reference forward in plain f32 JAX. bf16 matmul operands inside the
    # kernel loosen the tolerance (sigmoid outputs are in [0, 1]).
    ref = jax.nn.sigmoid(jax.nn.sigmoid(x @ w1 + b1) @ w2 + b2)
    assert out.shape == (batch, OUT_DIM)
    assert jnp.allclose(out, ref, atol=2e-2, rtol=0.0), (
        f"max abs err {jnp.max(jnp.abs(out - ref))}")

    print("KERNEL_OK")
</pallas_src>

<mosaic_0001>
module attributes {stable_mosaic.version = 11 : i64} {
  func.func @mlp_kernel(%arg0: i32, %arg1: memref<8x784xbf16, #tpu.memory_space<vmem>>, %arg2: memref<784x256xbf16, #tpu.memory_space<vmem>>, %arg3: memref<1x256xf32, #tpu.memory_space<vmem>>, %arg4: memref<256x128xbf16, #tpu.memory_space<vmem>>, %arg5: memref<1x128xf32, #tpu.memory_space<vmem>>, %arg6: memref<8x128xf32, #tpu.memory_space<vmem>>) attributes {dimension_semantics = [#tpu.dimension_semantics<parallel>], iteration_bounds = array<i64: 1>, scalar_prefetch = 0 : i64, scratch_operands = 0 : i64, tpu.core_type = #tpu.core_type<tc>, window_params = [{transform_indices = @transform_0, window_bounds = array<i64: 8, 784>}, {pipeline_mode = #tpu.pipeline_mode<synchronous>, transform_indices = @transform_1, window_bounds = array<i64: 784, 256>}, {pipeline_mode = #tpu.pipeline_mode<synchronous>, transform_indices = @transform_2, window_bounds = array<i64: 1, 256>}, {pipeline_mode = #tpu.pipeline_mode<synchronous>, transform_indices = @transform_3, window_bounds = array<i64: 256, 128>}, {pipeline_mode = #tpu.pipeline_mode<synchronous>, transform_indices = @transform_4, window_bounds = array<i64: 1, 128>}, {transform_indices = @transform_5, window_bounds = array<i64: 8, 128>}]} {
    %c0 = arith.constant 0 : index
    %c0_0 = arith.constant 0 : index
    %0 = vector.load %arg1[%c0, %c0_0] : memref<8x784xbf16, #tpu.memory_space<vmem>>, vector<8x784xbf16>
    %c0_1 = arith.constant 0 : index
    %c0_2 = arith.constant 0 : index
    %1 = vector.load %arg2[%c0_1, %c0_2] : memref<784x256xbf16, #tpu.memory_space<vmem>>, vector<784x256xbf16>
    %cst = arith.constant dense<0.000000e+00> : vector<8x256xf32>
    %2 = tpu.matmul %0, %1, %cst {dimension_numbers = #tpu.dot_dimension_numbers<[1], [0], [0], [1], [0, 0, 1, 1], [], []>} : vector<8x784xbf16>, vector<784x256xbf16>, vector<8x256xf32> -> vector<8x256xf32>
    %c0_3 = arith.constant 0 : index
    %c0_4 = arith.constant 0 : index
    %3 = vector.load %arg3[%c0_3, %c0_4] : memref<1x256xf32, #tpu.memory_space<vmem>>, vector<1x256xf32>
    %4 = vector.broadcast %3 : vector<1x256xf32> to vector<8x256xf32>
    %5 = arith.addf %2, %4 : vector<8x256xf32>
    %6 = arith.negf %5 : vector<8x256xf32>
    %7 = math.exp %6 : vector<8x256xf32>
    %cst_5 = arith.constant 1.000000e+00 : f32
    %8 = vector.broadcast %cst_5 : f32 to vector<8x256xf32>
    %9 = arith.addf %8, %7 : vector<8x256xf32>
    %10 = arith.divf %8, %9 : vector<8x256xf32>
    %11 = arith.truncf %10 : vector<8x256xf32> to vector<8x256xbf16>
    %c0_6 = arith.constant 0 : index
    %c0_7 = arith.constant 0 : index
    %12 = vector.load %arg4[%c0_6, %c0_7] : memref<256x128xbf16, #tpu.memory_space<vmem>>, vector<256x128xbf16>
    %cst_8 = arith.constant dense<0.000000e+00> : vector<8x128xf32>
    %13 = tpu.matmul %11, %12, %cst_8 {dimension_numbers = #tpu.dot_dimension_numbers<[1], [0], [0], [1], [0, 0, 1, 1], [], []>} : vector<8x256xbf16>, vector<256x128xbf16>, vector<8x128xf32> -> vector<8x128xf32>
    %c0_9 = arith.constant 0 : index
    %c0_10 = arith.constant 0 : index
    %14 = vector.load %arg5[%c0_9, %c0_10] : memref<1x128xf32, #tpu.memory_space<vmem>>, vector<1x128xf32>
    %15 = vector.broadcast %14 : vector<1x128xf32> to vector<8x128xf32>
    %16 = arith.addf %13, %15 : vector<8x128xf32>
    %17 = arith.negf %16 : vector<8x128xf32>
    %18 = math.exp %17 : vector<8x128xf32>
    %cst_11 = arith.constant 1.000000e+00 : f32
    %19 = vector.broadcast %cst_11 : f32 to vector<8x128xf32>
    %20 = arith.addf %19, %18 : vector<8x128xf32>
    %21 = arith.divf %19, %20 : vector<8x128xf32>
    %c0_12 = arith.constant 0 : index
    %c0_13 = arith.constant 0 : index
    %22 = vector.load %arg6[%c0_12, %c0_13] : memref<8x128xf32, #tpu.memory_space<vmem>>, vector<8x128xf32>
    tpu.vector_store %arg6[%c0_12, %c0_13], %21 {strides = array<i32>} : memref<8x128xf32, #tpu.memory_space<vmem>>, vector<8x128xf32>,
    return
  }
  func.func @transform_0(%arg0: i32) -> (i32, i32) {
    %c0_i32 = arith.constant 0 : i32
    %c0_i32_0 = arith.constant 0 : i32
    return %arg0, %c0_i32 : i32, i32
  }
  func.func @transform_1(%arg0: i32) -> (i32, i32) {
    %c0_i32 = arith.constant 0 : i32
    %c0_i32_0 = arith.constant 0 : i32
    %c0_i32_1 = arith.constant 0 : i32
    return %c0_i32, %c0_i32_0 : i32, i32
  }
  func.func @transform_2(%arg0: i32) -> (i32, i32) {
    %c0_i32 = arith.constant 0 : i32
    %c0_i32_0 = arith.constant 0 : i32
    %c0_i32_1 = arith.constant 0 : i32
    return %c0_i32, %c0_i32_0 : i32, i32
  }
  func.func @transform_3(%arg0: i32) -> (i32, i32) {
    %c0_i32 = arith.constant 0 : i32
    %c0_i32_0 = arith.constant 0 : i32
    %c0_i32_1 = arith.constant 0 : i32
    return %c0_i32, %c0_i32_0 : i32, i32
  }
  func.func @transform_4(%arg0: i32) -> (i32, i32) {
    %c0_i32 = arith.constant 0 : i32
    %c0_i32_0 = arith.constant 0 : i32
    %c0_i32_1 = arith.constant 0 : i32
    return %c0_i32, %c0_i32_0 : i32, i32
  }
  func.func @transform_5(%arg0: i32) -> (i32, i32) {
    %c0_i32 = arith.constant 0 : i32
    %c0_i32_0 = arith.constant 0 : i32
    return %arg0, %c0_i32 : i32, i32
  }
}

</mosaic_0001>

<bundles_post_ra>
// kernel: tpu_custom_call.1
= control target key start
LH: loop header
LB: loop body
LE: loop exit
PB: predicated region body
PF: predicated region fallthrough
CT: control target
= control target key end

     0   :  { %10 = vsyncpa [#allocation3], 0  ;;  %s1558_s0 = inlined_call_operand.hbm [shape: bf16[8,784], index: 0, kind: input, shape index: {}]   ;;  %s1559_s1 = inlined_call_operand.hbm [shape: bf16[784,256], index: 1, kind: input, shape index: {}]   ;;  %s1560_s2 = inlined_call_operand.vmem [shape: f32[1,256], index: 2, kind: input, shape index: {}]   ;;  %s1561_s3 = inlined_call_operand.hbm [shape: bf16[256,128], index: 3, kind: input, shape index: {}]   ;;  %s1562_s4 = inlined_call_operand.vmem [shape: f32[1,128], index: 4, kind: input, shape index: {}]   ;;  %s1563_s5 = inlined_call_operand.hbm [shape: f32[8,128], index: 5, kind: output, shape index: {}]  }
   0x1   :  { %11 = vsyncpa [#allocation6], 0 }
   0x2   :  { %12 = vsyncpa [#allocation4], 0  ;;  %s1494_s18 = smov [#allocation5]  }
   0x3   :  { %s28_s19 = sshll.u32 %s1494_s18, 4  ;;  %s29_s19 = int_to_ptr.vmem [resolvable:$true] %s28_s19 }
   0x4   :  { %s1416_s20 = scalar_lea.vmem %s29_s19, 12544  ;;  %p1421_p1 = scmp.lt.s32.totalorder %s29_s19, %s29_s19 }
   0x5   :  { %p1417_p0 = scmp.ne.s32.totalorder %s29_s19, %s1416_s20  ;;  %p1422_p2 = scmp.lt.s32.totalorder %s1416_s20, %s1416_s20 }
   0x7   :  { %p1423_p3 = por %p1422_p2, %p1421_p1 }
   0x9   :  { %p1424_p4 = pnand %p1423_p3, %p1417_p0 }
   0xb   :  { %1427 = shalt.err (!%p1424_p4)
}
   0xc   :  { %s1495_s21 = smov 128   ;;  %s1496_s22 = smov 8  }
   0xd   :  { %34 = dma.hbm_to_vmem [thread:$0]  %s1559_s1, 12544, %s29_s19, [#allocation6], %s1495_s21, %s1495_s21, %s1496_s22  }
   0xe   :  { %s1497_s25 = smov [#allocation2]   ;;  %s1498_s27 = smov [#allocation7]  }
   0xf   :  { %s19_s26 = sshll.u32 %s1497_s25, 4  ;;  %s42_s28 = sshll.u32 %s1498_s27, 4  ;;  %s20_s26 = int_to_ptr.vmem [resolvable:$true] %s19_s26  ;;  %s43_s28 = int_to_ptr.vmem [resolvable:$true] %s42_s28 }
  0x10   :  { %s1436_s29 = scalar_lea.vmem %s20_s26, 448  ;;  %p1441_p6 = scmp.lt.s32.totalorder %s20_s26, %s20_s26 }
  0x11   :  { %p1437_p5 = scmp.ne.s32.totalorder %s20_s26, %s1436_s29  ;;  %p1442_p7 = scmp.lt.s32.totalorder %s1436_s29, %s1436_s29 }
  0x13   :  { %p1443_p8 = por %p1442_p7, %p1441_p6 }
  0x15   :  { %p1444_p9 = pnand %p1443_p8, %p1437_p5 }
  0x17   :  { %1447 = shalt.err (!%p1444_p9)
}
  0x18   :  { %22 = dma.hbm_to_vmem [thread:$0]  %s1558_s0, 448, %s20_s26, [#allocation3]  }
  0x19   :  { %s1456_s7 = scalar_lea.vmem %s43_s28, 2048  ;;  %p1461_p11 = scmp.lt.s32.totalorder %s43_s28, %s43_s28 }
  0x1a   :  { %p1457_p10 = scmp.ne.s32.totalorder %s43_s28, %s1456_s7  ;;  %p1462_p12 = scmp.lt.s32.totalorder %s1456_s7, %s1456_s7 }
  0x1c   :  { %p1463_p13 = por %p1462_p12, %p1461_p11 }
  0x1e   :  { %p1464_p0 = pnand %p1463_p13, %p1457_p10 }
  0x20   :  { %1467 = shalt.err (!%p1464_p0)
}
  0x21   :  { %s1499_s1 = smov 64   ;;  %s1500_s8 = smov 4  }
  0x22   :  { %48 = dma.hbm_to_vmem [thread:$0]  %s1561_s3, 2048, %s43_s28, [#allocation6], %s1499_s1, %s1499_s1, %s1500_s8  }
  0x23   :  { %1488 = dma.done.wait [#allocation3], 448  }
  0x24   :  { %1489 = vsyncadd [#allocation3], 4294966848 }
  0x25   :  { %1490 = dma.done.wait [#allocation6], 14592  }
  0x26   :  { %1491 = vsyncadd [#allocation6], 4294952704  ;;  %v1226_v0 = vld [vmem:[#allocation5 + $0x74] ss:$8 sps:$4 sm:$0xff]   ;;  %v1228_v1 = vld [vmem:[#allocation5 + $0x70] ss:$8 sps:$4 sm:$0xff]  }
  0x27   :  { %693 = vmatprep.subr.bf16.mxu0 %v1226_v0  ;;  %v1229_v2 = vld [vmem:[#allocation5 + $0x174] ss:$8 sps:$4 sm:$0xff]   ;;  %v1231_v3 = vld [vmem:[#allocation5 + $0x170] ss:$8 sps:$4 sm:$0xff]   ;;  %v1232_v4 = vld [vmem:[#allocation5 + $0x64] ss:$8 sps:$4 sm:$0xff]  }
  0x28   :  { %694 = vmatpush1.bf16.msra.mxu0 %v1228_v1  ;;  %v1234_v5 = vld [vmem:[#allocation5 + $0x60] ss:$8 sps:$4 sm:$0xff]   ;;  %734 = vmatprep.subr.bf16.mxu1 %v1229_v2  ;;  %v1235_v6 = vld [vmem:[#allocation5 + $0x164] ss:$8 sps:$4 sm:$0xff]   ;;  %v1238_v8 = vld [vmem:[#allocation5 + $0x54] ss:$8 sps:$4 sm:$0xff]  }
  0x29   :  { %735 = vmatpush1.bf16.msra.mxu1 %v1231_v3  ;;  %695 = vmatprep.subr.bf16.mxu0 %v1232_v4  ;;  %v1237_v7 = vld [vmem:[#allocation5 + $0x160] ss:$8 sps:$4 sm:$0xff]   ;;  %v1240_v9 = vld [vmem:[#allocation5 + $0x50] ss:$8 sps:$4 sm:$0xff]   ;;  %v1241_v10 = vld [vmem:[#allocation5 + $0x154] ss:$8 sps:$4 sm:$0xff]  }
  0x2a   :  { %736 = vmatprep.subr.bf16.mxu1 %v1235_v6  ;;  %v1244_v11 = vld [vmem:[#allocation5 + $0x44] ss:$8 sps:$4 sm:$0xff]   ;;  %v1243_v12 = vld [vmem:[#allocation5 + $0x150] ss:$8 sps:$4 sm:$0xff]   ;;  %v1246_v14 = vld [vmem:[#allocation5 + $0x40] ss:$8 sps:$4 sm:$0xff]  }
  0x2b   :  { %v1247_v13 = vld [vmem:[#allocation5 + $0x144] ss:$8 sps:$4 sm:$0xff]   ;;  %v1250_v15 = vld [vmem:[#allocation5 + $0x34] ss:$8 sps:$4 sm:$0xff]   ;;  %v1249_v16 = vld [vmem:[#allocation5 + $0x140] ss:$8 sps:$4 sm:$0xff]  }
  0x2c   :  { %696 = vmatpush1.bf16.msra.mxu0 %v1234_v5  ;;  %v1253_v17 = vld [vmem:[#allocation5 + $0x134] ss:$8 sps:$4 sm:$0xff]   ;;  %v1252_v18 = vld [vmem:[#allocation5 + $0x30] ss:$8 sps:$4 sm:$0xff]   ;;  %v1256_v19 = vld [vmem:[#allocation5 + $0x24] ss:$8 sps:$4 sm:$0xff]  }
  0x2d   :  { %697 = vmatprep.subr.bf16.mxu0 %v1238_v8  ;;  %737 = vmatpush1.bf16.msra.mxu1 %v1237_v7  ;;  %v1255_v20 = vld [vmem:[#allocation5 + $0x130] ss:$8 sps:$4 sm:$0xff]   ;;  %v1259_v21 = vld [vmem:[#allocation5 + $0x124] ss:$8 sps:$4 sm:$0xff]   ;;  %v1258_v22 = vld [vmem:[#allocation5 + $0x20] ss:$8 sps:$4 sm:$0xff]  }
  0x2e   :  { %738 = vmatprep.subr.bf16.mxu1 %v1241_v10  ;;  %v1262_v23 = vld [vmem:[#allocation5 + $0x14] ss:$8 sps:$4 sm:$0xff]   ;;  %v1261_v24 = vld [vmem:[#allocation5 + $0x120] ss:$8 sps:$4 sm:$0xff]   ;;  %v1264_v26 = vld [vmem:[#allocation5 + $0x10] ss:$8 sps:$4 sm:$0xff]  }
  0x2f   :  { %v1265_v25 = vld [vmem:[#allocation5 + $0x114] ss:$8 sps:$4 sm:$0xff]   ;;  %v1268_v27 = vld [vmem:[#allocation5 + $0x4] ss:$8 sps:$4 sm:$0xff]   ;;  %v1267_v28 = vld [vmem:[#allocation5 + $0x110] ss:$8 sps:$4 sm:$0xff]  }
  0x30   :  { %698 = vmatpush1.bf16.msra.mxu0 %v1240_v9  ;;  %v1271_v29 = vld [vmem:[#allocation5 + $0x104] ss:$8 sps:$4 sm:$0xff]   ;;  %v1270_v30 = vld [vmem:[#allocation5] ss:$8 sps:$4 sm:$0xff]   ;;  %v1274_v31 = vld [vmem:[#allocation5 + $0xf4] ss:$8 sps:$4 sm:$0xff]  }
  0x31   :  { %699 = vmatprep.subr.bf16.mxu0 %v1244_v11  ;;  %739 = vmatpush1.bf16.msra.mxu1 %v1243_v12  ;;  %v1273_v32 = vld [vmem:[#allocation5 + $0x100] ss:$8 sps:$4 sm:$0xff]   ;;  %v1277_v33 = vld [vmem:[#allocation5 + $0x1f4] ss:$8 sps:$4 sm:$0xff]   ;;  %v1276_v34 = vld [vmem:[#allocation5 + $0xf0] ss:$8 sps:$4 sm:$0xff]  }
  0x32   :  { %740 = vmatprep.subr.bf16.mxu1 %v1247_v13  ;;  %v1280_v35 = vld [vmem:[#allocation5 + $0xe4] ss:$8 sps:$4 sm:$0xff]   ;;  %v1279_v36 = vld [vmem:[#allocation5 + $0x1f0] ss:$8 sps:$4 sm:$0xff]   ;;  %v1282_v38 = vld [vmem:[#allocation5 + $0xe0] ss:$8 sps:$4 sm:$0xff]  }
  0x33   :  { %v1283_v37 = vld [vmem:[#allocation5 + $0x1e4] ss:$8 sps:$4 sm:$0xff]   ;;  %v1286_v39 = vld [vmem:[#allocation5 + $0xd4] ss:$8 sps:$4 sm:$0xff]   ;;  %v1285_v40 = vld [vmem:[#allocation5 + $0x1e0] ss:$8 sps:$4 sm:$0xff]  }
  0x34   :  { %700 = vmatpush1.bf16.msra.mxu0 %v1246_v14  ;;  %v1289_v41 = vld [vmem:[#allocation5 + $0x1d4] ss:$8 sps:$4 sm:$0xff]   ;;  %v1288_v42 = vld [vmem:[#allocation5 + $0xd0] ss:$8 sps:$4 sm:$0xff]   ;;  %v1292_v43 = vld [vmem:[#allocation5 + $0xc4] ss:$8 sps:$4 sm:$0xff]  }
  0x35   :  { %701 = vmatprep.subr.bf16.mxu0 %v1250_v15  ;;  %741 = vmatpush1.bf16.msra.mxu1 %v1249_v16  ;;  %v1291_v44 = vld [vmem:[#allocation5 + $0x1d0] ss:$8 sps:$4 sm:$0xff]   ;;  %v1295_v45 = vld [vmem:[#allocation5 + $0x1c4] ss:$8 sps:$4 sm:$0xff]   ;;  %v1294_v47 = vld [vmem:[#allocation5 + $0xc0] ss:$8 sps:$4 sm:$0xff]  }
  0x36   :  { %742 = vmatprep.subr.bf16.mxu1 %v1253_v17  ;;  %v61_v46 = vld [vmem:[#allocation2] sm:$0xff]  ;;  %v1298_v49 = vld [vmem:[#allocation5 + $0xb4] ss:$8 sps:$4 sm:$0xff]   ;;  %v62_v50 = vld [vmem:[#allocation2 + $0x8] sm:$0xff]  ;;  %vm689_vm0 = vcmask 130048   ;;  %v1501_v16 = vmov 0  }
  0x37   :  { %v1070_v48 = vcombine.high %v61_v46, %v61_v46  ;;  %v1297_v51 = vld [vmem:[#allocation5 + $0x1c0] ss:$8 sps:$4 sm:$0xff]   ;;  %v1072_v52 = vcombine.high %v62_v50, %v62_v50  ;;  %v1301_v53 = vld [vmem:[#allocation5 + $0x1b4] ss:$8 sps:$4 sm:$0xff]   ;;  %v1300_v54 = vld [vmem:[#allocation5 + $0xb0] ss:$8 sps:$4 sm:$0xff]   ;;  %v1069_v5 = vcombine.low %v61_v46, %v61_v46  ;;  %v1071_v7 = vcombine.low %v62_v50, %v62_v50 }
  0x38   :  { %702 = vmatpush1.bf16.msra.mxu0 %v1252_v18  ;;  %v1304_v55 = vld [vmem:[#allocation5 + $0xa4] ss:$8 sps:$4 sm:$0xff]   ;;  %v1303_v56 = vld [vmem:[#allocation5 + $0x1b0] ss:$8 sps:$4 sm:$0xff]   ;;  %v1306_v58 = vld [vmem:[#allocation5 + $0xa0] ss:$8 sps:$4 sm:$0xff]  }
  0x39   :  { %703 = vmatprep.subr.bf16.mxu0 %v1256_v19  ;;  %743 = vmatpush1.bf16.msra.mxu1 %v1255_v20  ;;  %v1307_v57 = vld [vmem:[#allocation5 + $0x1a4] ss:$8 sps:$4 sm:$0xff]   ;;  %v1310_v59 = vld [vmem:[#allocation5 + $0x94] ss:$8 sps:$4 sm:$0xff]   ;;  %v1309_v60 = vld [vmem:[#allocation5 + $0x1a0] ss:$8 sps:$4 sm:$0xff]  }
  0x3a   :  { %744 = vmatprep.subr.bf16.mxu1 %v1259_v21  ;;  %725 = vmatprep.mubr.bf16.mxu0 %v1070_v48  ;;  %v1313_v61 = vld [vmem:[#allocation5 + $0x194] ss:$8 sps:$4 sm:$0xff]   ;;  %v1312_v62 = vld [vmem:[#allocation5 + $0x90] ss:$8 sps:$4 sm:$0xff]   ;;  %v1316_v63 = vld [vmem:[#allocation5 + $0x84] ss:$8 sps:$4 sm:$0xff]  }
  0x3b   :  { %766 = vmatprep.mubr.bf16.mxu1 %v1072_v52  ;;  %v1315_v0 = vld [vmem:[#allocation5 + $0x190] ss:$8 sps:$4 sm:$0xff]   ;;  %v1319_v1 = vld [vmem:[#allocation5 + $0x184] ss:$8 sps:$4 sm:$0xff]   ;;  %v1318_v2 = vld [vmem:[#allocation5 + $0x80] ss:$8 sps:$4 sm:$0xff]  }
  0x3c   :  { %704 = vmatpush1.bf16.msra.mxu0 %v1258_v22  ;;  %v1326_v3 = vld [vmem:[#allocation5 + $0x274] ss:$8 sps:$4 sm:$0xff]   ;;  %v1323_v4 = vld [vmem:[#allocation5 + $0x180] ss:$8 sps:$4 sm:$0xff]   ;;  %v1324_v6 = vld [vmem:[#allocation5 + $0x270] ss:$8 sps:$4 sm:$0xff]  }
  0x3d   :  { %705 = vmatprep.subr.bf16.mxu0 %v1262_v23  ;;  %745 = vmatpush1.bf16.msra.mxu1 %v1261_v24  ;;  %v1331_v8 = vld [vmem:[#allocation5 + $0x264] ss:$8 sps:$4 sm:$0xff]   ;;  %v1371_v10 = vld [vmem:[#allocation5 + $0x300] ss:$8 sps:$4 sm:$0xff]   ;;  %v1542_v12 = vld [vmem:[#allocation2 + $0x10] sm:$0xff]  ;;  %s1502_s12 = smov [#allocation8]  }
  0x3e   :  { %746 = vmatprep.subr.bf16.mxu1 %v1265_v25  ;;  %v1373_v9 = vld [vmem:[#allocation5 + $0x304] ss:$8 sps:$4 sm:$0xff]   ;;  %v1329_v11 = vld [vmem:[#allocation5 + $0x260] ss:$8 sps:$4 sm:$0xff]   ;;  %v1334_v13 = vld [vmem:[#allocation5 + $0x254] ss:$8 sps:$4 sm:$0xff]   ;;  %v1074_v14 = vcombine.high %v1542_v12, %v1542_v12 }
  0x3f   :  { %v1332_v15 = vld [vmem:[#allocation5 + $0x250] ss:$8 sps:$4 sm:$0xff]   ;;  %v1337_v17 = vld [vmem:[#allocation5 + $0x244] ss:$8 sps:$4 sm:$0xff]   ;;  %v1377_v18 = vld [vmem:[#allocation2 + $0x18] ss:$0 sps:$4 sm:$0xff]  }
  0x40   :  { %706 = vmatpush1.bf16.msra.mxu0 %v1264_v26  ;;  %v1335_v19 = vld [vmem:[#allocation5 + $0x240] ss:$8 sps:$4 sm:$0xff]   ;;  %v1340_v20 = vld [vmem:[#allocation5 + $0x234] ss:$8 sps:$4 sm:$0xff]   ;;  %v1338_v21 = vld [vmem:[#allocation5 + $0x230] ss:$8 sps:$4 sm:$0xff]  }
  0x41   :  { %707 = vmatprep.subr.bf16.mxu0 %v1268_v27  ;;  %747 = vmatpush1.bf16.msra.mxu1 %v1267_v28  ;;  %v1343_v22 = vld [vmem:[#allocation5 + $0x224] ss:$8 sps:$4 sm:$0xff]   ;;  %v1341_v23 = vld [vmem:[#allocation5 + $0x220] ss:$8 sps:$4 sm:$0xff]   ;;  %v1346_v24 = vld [vmem:[#allocation5 + $0x214] ss:$8 sps:$4 sm:$0xff]  }
  0x42   :  { %748 = vmatprep.subr.bf16.mxu1 %v1271_v29  ;;  %v1344_v25 = vld [vmem:[#allocation5 + $0x210] ss:$8 sps:$4 sm:$0xff]   ;;  %v1349_v26 = vld [vmem:[#allocation5 + $0x204] ss:$8 sps:$4 sm:$0xff]   ;;  %v1347_v27 = vld [vmem:[#allocation5 + $0x200] ss:$8 sps:$4 sm:$0xff]  }
  0x43   :  { %v1352_v28 = vld [vmem:[#allocation5 + $0x2f4] ss:$8 sps:$4 sm:$0xff]   ;;  %v1350_v29 = vld [vmem:[#allocation5 + $0x2f0] ss:$8 sps:$4 sm:$0xff]   ;;  %v1381_v46 = vld [vmem:[#allocation7 + $0x38] sm:$0xff]   ;;  %s1059_s13 = sshll.u32 %s1502_s12, 4  ;;  %s1060_s13 = int_to_ptr.vmem [resolvable:$true] %s1059_s13 }
  0x44   :  { %708 = vmatpush1.bf16.msra.mxu0 %v1270_v30  ;;  %v1355_v30 = vld [vmem:[#allocation5 + $0x2e4] ss:$8 sps:$4 sm:$0xff]   ;;  %v1385_v50 = vld [vmem:[#allocation7 + $0x28] sm:$0xff]   ;;  %v1387_v52 = vld [vmem:[#allocation7 + $0x20] sm:$0xff]   ;;  %s1468_s14 = scalar_lea.vmem %s1060_s13, 128  ;;  %p1473_p2 = scmp.lt.s32.totalorder %s1060_s13, %s1060_s13 }
  0x45   :  { %709 = vmatprep.subr.bf16.mxu0 %v1274_v31  ;;  %749 = vmatpush1.bf16.msra.mxu1 %v1273_v32  ;;  %v1353_v31 = vld [vmem:[#allocation5 + $0x2e0] ss:$8 sps:$4 sm:$0xff]   ;;  %v1358_v32 = vld [vmem:[#allocation5 + $0x2d4] ss:$8 sps:$4 sm:$0xff]   ;;  %p1469_p1 = scmp.ne.s32.totalorder %s1060_s13, %s1468_s14  ;;  %p1474_p3 = scmp.lt.s32.totalorder %s1468_s14, %s1468_s14 }
  0x46   :  { %750 = vmatprep.subr.bf16.mxu1 %v1277_v33  ;;  %v1356_v33 = vld [vmem:[#allocation5 + $0x2d0] ss:$8 sps:$4 sm:$0xff]   ;;  %v1383_v48 = vld [vmem:[#allocation7 + $0x30] sm:$0xff]  }
  0x47   :  { %p1475_p4 = por %p1474_p3, %p1473_p2 }
  0x48   :  { %710 = vmatpush2.bf16.msra.mxu0 %v1276_v34  ;;  %v1361_v34 = vld [vmem:[#allocation5 + $0x2c4] ss:$8 sps:$4 sm:$0xff]  }
  0x49   :  { %711 = vmatprep.subr.bf16.mxu0 %v1280_v35  ;;  %751 = vmatpush2.bf16.msra.mxu1 %v1279_v36  ;;  %v1359_v35 = vld [vmem:[#allocation5 + $0x2c0] ss:$8 sps:$4 sm:$0xff]   ;;  %v1364_v36 = vld [vmem:[#allocation5 + $0x2b4] ss:$8 sps:$4 sm:$0xff]   ;;  %p1476_p5 = pnand %p1475_p4, %p1469_p1 }
  0x4a   :  { %752 = vmatprep.subr.bf16.mxu1 %v1283_v37  ;;  %v1362_v37 = vld [vmem:[#allocation5 + $0x2b0] ss:$8 sps:$4 sm:$0xff]  }
  0x4c   :  { %712 = vmatpush2.bf16.msra.mxu0 %v1282_v38  ;;  %v1367_v38 = vld [vmem:[#allocation5 + $0x2a4] ss:$8 sps:$4 sm:$0xff]  }
  0x4d   :  { %713 = vmatprep.subr.bf16.mxu0 %v1286_v39  ;;  %753 = vmatpush2.bf16.msra.mxu1 %v1285_v40  ;;  %v1365_v39 = vld [vmem:[#allocation5 + $0x2a0] ss:$8 sps:$4 sm:$0xff]   ;;  %v1370_v40 = vld [vmem:[#allocation5 + $0x294] ss:$8 sps:$4 sm:$0xff]  }
  0x4e   :  { %754 = vmatprep.subr.bf16.mxu1 %v1289_v41  ;;  %v1368_v41 = vld [vmem:[#allocation5 + $0x290] ss:$8 sps:$4 sm:$0xff]  }
  0x50   :  { %714 = vmatpush2.bf16.msra.mxu0 %v1288_v42  ;;  %v1376_v42 = vld [vmem:[#allocation5 + $0x284] ss:$8 sps:$4 sm:$0xff]  }
  0x51   :  { %715 = vmatprep.subr.bf16.mxu0 %v1292_v43  ;;  %755 = vmatpush2.bf16.msra.mxu1 %v1291_v44  ;;  %v1374_v43 = vld [vmem:[#allocation5 + $0x280] ss:$8 sps:$4 sm:$0xff]   ;;  %v1073_v44 = vcombine.low %v1542_v12, %v1542_v12  ;;  %v163_v12 = vld [vmem:[%s1560_s2] sm:$0x3] }
  0x52   :  { %756 = vmatprep.subr.bf16.mxu1 %v1295_v45  ;;  %v1380_v45 = vld [vmem:[#allocation7 + $0x78] sm:$0xff]  }
  0x54   :  { %716 = vmatpush2.bf16.msra.mxu0 %v1294_v47  ;;  %v1382_v47 = vld [vmem:[#allocation7 + $0x70] sm:$0xff]  }
  0x55   :  { %717 = vmatprep.subr.bf16.mxu0 %v1298_v49  ;;  %757 = vmatpush2.bf16.msra.mxu1 %v1297_v51  ;;  %v1384_v49 = vld [vmem:[#allocation7 + $0x68] sm:$0xff]   ;;  %v1386_v51 = vld [vmem:[#allocation7 + $0x60] sm:$0xff]  }
  0x56   :  { %758 = vmatprep.subr.bf16.mxu1 %v1301_v53  ;;  %v1388_v53 = vld [vmem:[#allocation7 + $0x58] sm:$0xff]  }
  0x58   :  { %718 = vmatpush2.bf16.msra.mxu0 %v1300_v54  ;;  %v1389_v54 = vld [vmem:[#allocation7 + $0x18] sm:$0xff]  }
  0x59   :  { %719 = vmatprep.subr.bf16.mxu0 %v1304_v55  ;;  %759 = vmatpush2.bf16.msra.mxu1 %v1303_v56  ;;  %v1390_v55 = vld [vmem:[#allocation7 + $0x50] sm:$0xff]  }
  0x5a   :  { %760 = vmatprep.subr.bf16.mxu1 %v1307_v57  ;;  %v1391_v56 = vld [vmem:[#allocation7 + $0x10] sm:$0xff]   ;;  %v1392_v57 = vld [vmem:[#allocation7 + $0x48] sm:$0xff]  }
  0x5c   :  { %720 = vmatpush2.bf16.msra.mxu0 %v1306_v58  ;;  %v1393_v58 = vld [vmem:[#allocation7 + $0x8] sm:$0xff]  }
  0x5d   :  { %721 = vmatprep.subr.bf16.mxu0 %v1310_v59  ;;  %761 = vmatpush2.bf16.msra.mxu1 %v1309_v60  ;;  %v1394_v59 = vld [vmem:[#allocation7 + $0x40] sm:$0xff]  }
  0x5e   :  { %762 = vmatprep.subr.bf16.mxu1 %v1313_v61  ;;  %v1395_v60 = vld [vmem:[#allocation7] sm:$0xff]  }
  0x60   :  { %722 = vmatpush2.bf16.msra.mxu0 %v1312_v62 }
  0x61   :  { %723 = vmatprep.subr.bf16.mxu0 %v1316_v63  ;;  %763 = vmatpush2.bf16.msra.mxu1 %v1315_v0 }
  0x62   :  { %764 = vmatprep.subr.bf16.mxu1 %v1319_v1 }
  0x64   :  { %724 = vmatpush2.bf16.msra.mxu0 %v1318_v2 }
  0x65   :  { %775 = vmatprep.subr.bf16.mxu0 %v1326_v3  ;;  %765 = vmatpush2.bf16.msra.mxu1 %v1323_v4 }
  0x66   :  { %830 = vmatprep.subr.bf16.mxu1 %v1373_v9  ;;  %v165_v9 = vlaneseq }
  0x67   :  { %726 = vmatmul.mubr.bf16.vlgmr.msra.gmra.mxu0 %v1069_v5 }
  0x68   :  { %776 = vmatpush1.bf16.msra.mxu0 %v1324_v6  ;;  %767 = vmatmul.mubr.bf16.vlgmr.msra.gmra.mxu1 %v1071_v7 }
  0x69   :  { %777 = vmatprep.subr.bf16.mxu0 %v1331_v8  ;;  %831 = vmatpush1.bf16.msra.mxu1 %v1371_v10  ;;  %v166_v10 = vshrl.u32 %v165_v9, 7 }
  0x6a   :  { %848 = vmatprep.mubr.bf16.mxu1 %v1501_v16  ;;  %807 = vmatprep.mubr.bf16.mxu0 %v1074_v14 }
  0x6b   :  { %1195 = vmatprep.subr.bf16.mxu1 %v1380_v45 }
  0x6c   :  { %778 = vmatpush1.bf16.msra.mxu0 %v1329_v11  ;;  %v167_v11 = vsub.s32 0, %v166_v10 }
  0x6d   :  { %779 = vmatprep.subr.bf16.mxu0 %v1334_v13  ;;  %v171_v13 = vsub.s32 1, %v166_v10 }
  0x6e   :  { %v168_v14 = vrot.slane %v163_v12, %v167_v11 }
  0x70   :  { %780 = vmatpush1.bf16.msra.mxu0 %v1332_v15  ;;  %1174 = vmatmul.mubr.msk.bf16.vlgmr.msra.gmra.mxu1 %vm689_vm0, %v1377_v18  ;;  %v172_v15 = vrot.slane %v163_v12, %v171_v13 }
  0x71   :  { %781 = vmatprep.subr.bf16.mxu0 %v1337_v17  ;;  %1196 = vmatpush3.bf16.msra.mxu1 %v1381_v46 }
  0x72   :  { %1197 = vmatprep.subr.bf16.mxu1 %v1382_v47 }
  0x74   :  { %782 = vmatpush1.bf16.msra.mxu0 %v1335_v19 }
  0x75   :  { %783 = vmatprep.subr.bf16.mxu0 %v1340_v20  ;;  %1198 = vmatpush3.bf16.msra.mxu1 %v1383_v48 }
  0x76   :  { %1199 = vmatprep.subr.bf16.mxu1 %v1384_v49 }
  0x78   :  { %784 = vmatpush1.bf16.msra.mxu0 %v1338_v21 }
  0x79   :  { %785 = vmatprep.subr.bf16.mxu0 %v1343_v22  ;;  %1200 = vmatpush3.bf16.msra.mxu1 %v1385_v50 }
  0x7a   :  { %1201 = vmatprep.subr.bf16.mxu1 %v1386_v51 }
  0x7c   :  { %786 = vmatpush1.bf16.msra.mxu0 %v1341_v23 }
  0x7d   :  { %787 = vmatprep.subr.bf16.mxu0 %v1346_v24  ;;  %1202 = vmatpush3.bf16.msra.mxu1 %v1387_v52 }
  0x7e   :  { %1203 = vmatprep.subr.bf16.mxu1 %v1388_v53 }
  0x80   :  { %788 = vmatpush1.bf16.msra.mxu0 %v1344_v25 }
  0x81   :  { %789 = vmatprep.subr.bf16.mxu0 %v1349_v26  ;;  %1204 = vmatpush3.bf16.msra.mxu1 %v1389_v54 }
  0x82   :  { %1205 = vmatprep.subr.bf16.mxu1 %v1390_v55 }
  0x84   :  { %790 = vmatpush1.bf16.msra.mxu0 %v1347_v27 }
  0x85   :  { %791 = vmatprep.subr.bf16.mxu0 %v1352_v28  ;;  %1206 = vmatpush3.bf16.msra.mxu1 %v1391_v56 }
  0x86   :  { %1207 = vmatprep.subr.bf16.mxu1 %v1392_v57 }
  0x88   :  { %792 = vmatpush2.bf16.msra.mxu0 %v1350_v29 }
  0x89   :  { %793 = vmatprep.subr.bf16.mxu0 %v1355_v30  ;;  %1208 = vmatpush3.bf16.msra.mxu1 %v1393_v58 }
  0x8a   :  { %1209 = vmatprep.subr.bf16.mxu1 %v1394_v59 }
  0x8c   :  { %794 = vmatpush2.bf16.msra.mxu0 %v1353_v31 }
  0x8d   :  { %795 = vmatprep.subr.bf16.mxu0 %v1358_v32  ;;  %1210 = vmatpush3.bf16.msra.mxu1 %v1395_v60 }
  0x90   :  { %796 = vmatpush2.bf16.msra.mxu0 %v1356_v33 }
  0x91   :  { %797 = vmatprep.subr.bf16.mxu0 %v1361_v34 }
  0x94   :  { %798 = vmatpush2.bf16.msra.mxu0 %v1359_v35 }
  0x95   :  { %799 = vmatprep.subr.bf16.mxu0 %v1364_v36 }
  0x98   :  { %800 = vmatpush2.bf16.msra.mxu0 %v1362_v37 }
  0x99   :  { %801 = vmatprep.subr.bf16.mxu0 %v1367_v38 }
  0x9c   :  { %802 = vmatpush2.bf16.msra.mxu0 %v1365_v39  ;;  %v1177_v39 = vld [vmem:[%s1562_s4] ss:$0 sm:$0xff] }
  0x9d   :  { %803 = vmatprep.subr.bf16.mxu0 %v1370_v40 }
  0xa0   :  { %804 = vmatpush2.bf16.msra.mxu0 %v1368_v41 }
  0xa1   :  { %805 = vmatprep.subr.bf16.mxu0 %v1376_v42 }
  0xa4   :  { %806 = vmatpush2.bf16.msra.mxu0 %v1374_v43 }
  0xa7   :  { %808 = vmatmul.mubr.bf16.vlgmr.msra.gmra.mxu0 %v1073_v44 }
 0x127   :  { %v727_v61 = vpop.f32.mrf.mxu0 }
 0x128   :  { %v768_v63 = vpop.f32.mrf.mxu1  ;;  %v728_v16 = vadd.f32 %v727_v61, %v168_v14 }
 0x129   :  { %v729_v62 = vpop.f32.mrf.mxu0 }
 0x12a   :  { %v770_v1 = vpop.f32.mrf.mxu1  ;;  %v730_v17 = vadd.f32 %v729_v62, %v172_v15  ;;  %v769_v18 = vadd.f32 %v768_v63, %v728_v16 }
 0x12b   :  { %v731_v0 = vpop.f32.mrf.mxu0 }
 0x12c   :  { %v772_v3 = vpop.f32.mrf.mxu1  ;;  %v771_v20 = vadd.f32 %v770_v1, %v730_v17 }
 0x12d   :  { %v732_v2 = vpop.f32.mrf.mxu0 }
 0x12e   :  { %v773_v4 = vpop.f32.mrf.mxu1 }
 0x130   :  { %v850_v5 = vpop.f32.mrf.mxu1 }
 0x132   :  { %v852_v6 = vpop.f32.mrf.mxu1 }
 0x134   :  { %v854_v7 = vpop.f32.mrf.mxu1 }
 0x136   :  { %v855_v8 = vpop.f32.mrf.mxu1 }
 0x167   :  { %v809_v19 = vpop.f32.mrf.mxu0 }
 0x168   :  { %v810_v21 = vadd.f32 %v809_v19, %v769_v18 }
 0x169   :  { %v811_v22 = vpop.f32.mrf.mxu0 }
 0x16a   :  { %v851_v23 = vadd.f32 %v850_v5, %v810_v21  ;;  %v812_v24 = vadd.f32 %v811_v22, %v771_v20 }
 0x16b   :  { %v813_v25 = vpop.f32.mrf.mxu0 }
 0x16c   :  { %v1175_v26 = vmul.f32 -1.442695, %v851_v23  ;;  %v853_v27 = vadd.f32 %v852_v6, %v812_v24 }
 0x16d   :  { %v814_v28 = vpop.f32.mrf.mxu0 }
 0x16e   :  { %1396 = vpow2.f32 %v1175_v26  ;;  %v1176_v29 = vmul.f32 -1.442695, %v853_v27 }
 0x170   :  { %1398 = vpow2.f32 %v1176_v29 }
 0x17b   :  { %v1397_v30 = vpop.eup %1396 }
 0x17c   :  { %v863_v31 = vadd.f32 1.0, %v1397_v30 }
 0x17d   :  { %v1399_v32 = vpop.eup %1398 }
 0x17e   :  { %v864_v33 = vadd.f32 1.0, %v1399_v32  ;;  %1400 = vrcp.f32 %v863_v31 }
 0x180   :  { %1402 = vrcp.f32 %v864_v33 }
 0x18b   :  { %v1401_v34 = vpop.eup %1400 }
 0x18c   :  { %v869_v37 = vpack.c.bf16 %v1401_v34, %v1401_v34 }
 0x18d   :  { %v1403_v35 = vpop.eup %1402 }
 0x18e   :  { %v870_v36 = vpack.c.bf16 %v1403_v35, %v1403_v35 }
 0x190   :  { %1038 = vmatprep.mubr.bf16.mxu1 %v870_v36 }
 0x191   :  { %1039 = vmatmul.mubr.bf16.vlgmr.msra.gmra.mxu1 %v869_v37 }
 0x251   :  { %v1211_v38 = vpop.f32.mrf.mxu1 }
 0x253   :  { %v1212_v40 = vpop.f32.mrf.mxu1 }
 0x254   :  { %v1213_v41 = vadd.f32 %v1212_v40, %v1211_v38 }
 0x255   :  { %v1214_v42 = vpop.f32.mrf.mxu1 }
 0x256   :  { %v1041_v43 = vadd.f32 %v1213_v41, %v1177_v39 }
 0x257   :  { %v1215_v44 = vpop.f32.mrf.mxu1 }
 0x258   :  { %v1194_v45 = vmul.f32 -1.442695, %v1041_v43 }
 0x25a   :  { %1404 = vpow2.f32 %v1194_v45 }
 0x267   :  { %v1405_v46 = vpop.eup %1404 }
 0x268   :  { %v1049_v47 = vadd.f32 1.0, %v1405_v46 }
 0x26a   :  { %1406 = vrcp.f32 %v1049_v47 }
 0x277   :  { %v1407_v48 = vpop.eup %1406 }
 0x278   :  { %1052 = vst [vmem:[#allocation8] sm:$0xff] %v1407_v48 }
 0x279   :  { %1479 = shalt.err (!%p1476_p5)
}
 0x27a   :  { %1062 = dma.vmem_to_hbm [thread:$0]  %s1060_s13, 128, %s1563_s5, [#allocation4]  }
 0x27b   :  { %1492 = dma.done.wait [#allocation4], 128  }
 0x27c   :  { %1493 = vsyncadd [#allocation4], 4294967168 }
 0x27d   :  { %1066 = vsyncpa [#allocation3], 1 }
 0x27e   :  { %1067 = vsyncpa [#allocation6], 1 }
 0x27f   :  { %1068 = vsyncpa [#allocation4], 1 }

</bundles_post_ra>
